<compile_context>
chip_gen: v5e
topology: v5e:2x2
jax: 0.10.0
libtpu: 0.0.40
codegen_flags: <defaults>
</compile_context>

<pallas_src>
import functools

import jax
import jax.numpy as jnp
from jax import lax
from jax.experimental import pallas as pl
from jax.experimental.pallas import tpu as pltpu

LANE = 128  # lane alignment for K and N


def _detect_num_tensorcores():
    """Best-effort TensorCore-per-device count (2 on v7x, else 1)."""
    try:
        dev = jax.devices()[0]
        for attr in ("num_cores", "core_count"):
            v = getattr(dev, attr, None)
            if isinstance(v, int) and v > 0:
                return v
    except Exception:
        pass
    return 1


_NUM_TC = _detect_num_tensorcores()


# ----------------------------- Pallas kernel --------------------------------

def _mm_bn_kernel(*refs, relu, has_residual):
    """refs order: a, b, bias, [residual], out, acc_scratch.

    Grid = (M blocks, N blocks, K blocks); K is the innermost reduction axis.
    """
    if has_residual:
        a_ref, b_ref, c_ref, r_ref, o_ref, acc_ref = refs
    else:
        a_ref, b_ref, c_ref, o_ref, acc_ref = refs
        r_ref = None

    k = pl.program_id(2)

    @pl.when(k == 0)
    def _init():
        acc_ref[...] = jnp.zeros_like(acc_ref)

    acc_ref[...] += jnp.dot(a_ref[...], b_ref[...],
                            preferred_element_type=jnp.float32)

    @pl.when(k == pl.num_programs(2) - 1)
    def _finalize():
        acc = acc_ref[...] + c_ref[...]
        if has_residual:
            acc = acc + r_ref[...].astype(jnp.float32)
        if relu:
            acc = jnp.maximum(acc, 0.0)
        o_ref[...] = acc.astype(o_ref.dtype)


# ------------------------------ wrappers -------------------------------------

def _round_up(x, m):
    return ((x + m - 1) // m) * m


def _pad_axis(x, target, axis):
    pad = target - x.shape[axis]
    if pad == 0:
        return x
    cfg = [(0, 0)] * x.ndim
    cfg[axis] = (0, pad)
    return jnp.pad(x, cfg)


def _pick_k_tiling(K):
    """Return (tk, Kp): K block size (multiple of 128) and padded K."""
    Kp0 = _round_up(K, LANE)
    if Kp0 <= 1280:                       # single K block; B panel <= ~320 KiB
        return Kp0, Kp0
    best = None
    for cand in (512, 640, 768, 896, 1024):
        kp = _round_up(Kp0, cand)
        key = (kp, -cand)                  # least padding, then biggest tk
        if best is None or key < best[0]:
            best = (key, cand, kp)
    return best[1], best[2]


def matmul_bn_epilogue(a, b, bias, residual=None, relu=True,
                       out_dtype=jnp.bfloat16):
    """(a @ b) + bias [+ residual], optional ReLU.

    a:[M,K], b:[K,N] (f32, BN scale pre-folded into columns by the caller).
    Matmul inputs cast to bf16, f32 accumulation in VMEM scratch, f32 epilogue.
    """
    M, K = a.shape
    K2, N = b.shape
    assert K == K2

    # Tile selection.
    Np0 = _round_up(N, LANE)
    tn = min(Np0, 256)                       # full MXU width on v5e/v6e
    Np = _round_up(N, tn)
    tm = 256 if M >= 256 else _round_up(max(M, 1), 16)
    Mp = _round_up(M, tm)
    tk, Kp = _pick_k_tiling(K)

    # v7x: if the parallel grid collapsed to a single step, split M so both
    # TensorCores get work. No effect on single-TC parts.
    if _NUM_TC > 1 and (Mp // tm) * (Np // tn) == 1 and tm >= 32 and tm % 32 == 0:
        tm //= 2

    a_p = _pad_axis(_pad_axis(a, Mp, 0), Kp, 1).astype(jnp.bfloat16)
    b_p = _pad_axis(_pad_axis(b, Kp, 0), Np, 1).astype(jnp.bfloat16)
    c_p = _pad_axis(bias.reshape(1, -1).astype(jnp.float32), Np, 1)

    in_specs = [
        pl.BlockSpec((tm, tk), lambda i, j, k: (i, k)),
        pl.BlockSpec((tk, tn), lambda i, j, k: (k, j)),
        pl.BlockSpec((1, tn), lambda i, j, k: (0, j)),
    ]
    args = [a_p, b_p, c_p]
    if residual is not None:
        r_p = _pad_axis(_pad_axis(residual, Mp, 0), Np, 1).astype(jnp.bfloat16)
        in_specs.append(pl.BlockSpec((tm, tn), lambda i, j, k: (i, j)))
        args.append(r_p)

    kernel = functools.partial(_mm_bn_kernel, relu=relu,
                               has_residual=residual is not None)

    out = pl.pallas_call(
        kernel,
        out_shape=jax.ShapeDtypeStruct((Mp, Np), out_dtype),
        grid=(Mp // tm, Np // tn, Kp // tk),
        in_specs=in_specs,
        out_specs=pl.BlockSpec((tm, tn), lambda i, j, k: (i, j)),
        scratch_shapes=[pltpu.VMEM((tm, tn), jnp.float32)],
        compiler_params=pltpu.CompilerParams(
            dimension_semantics=("parallel", "parallel", "arbitrary"),
            vmem_limit_bytes=32 * 1024 * 1024),
    )(*args)
    return out[:M, :N]


def _im2col(x, kh, kw, stride, pad):
    """x: NHWC -> patch matrix [N*Ho*Wo, kh*kw*C] (feature order kh, kw, C)."""
    N, H, W, C = x.shape
    xp = jnp.pad(x, ((0, 0), (pad, pad), (pad, pad), (0, 0)))
    Ho = (H + 2 * pad - kh) // stride + 1
    Wo = (W + 2 * pad - kw) // stride + 1
    cols = []
    for ky in range(kh):
        for kx in range(kw):
            cols.append(
                lax.slice(
                    xp,
                    (0, ky, kx, 0),
                    (N, ky + (Ho - 1) * stride + 1, kx + (Wo - 1) * stride + 1, C),
                    (1, stride, stride, 1),
                )
            )
    patches = jnp.concatenate(cols, axis=-1)
    return patches.reshape(N * Ho * Wo, kh * kw * C), (N, Ho, Wo)


def conv_bn(x, w, bn_scale, bn_shift, stride, pad, relu=True, residual=None):
    """Conv2d(bias=False) + folded BatchNorm (+ residual) (+ ReLU). x: NHWC."""
    cout, cin, kh, kw = w.shape
    a, (n, ho, wo) = _im2col(x, kh, kw, stride, pad)
    b = jnp.transpose(w, (2, 3, 1, 0)).reshape(kh * kw * cin, cout)
    b = b * bn_scale[None, :]            # fold BN scale into f32 weights
    res2d = None if residual is None else residual.reshape(n * ho * wo, cout)
    y = matmul_bn_epilogue(a, b, bias=bn_shift, residual=res2d, relu=relu,
                           out_dtype=jnp.bfloat16)
    return y.reshape(n, ho, wo, cout)


def conv1_s2d(x, w, bn_scale, bn_shift):
    """ResNet stem: 7x7/s2/p3 conv == 2x2 space-to-depth + 4x4/s1 conv."""
    n, h, wd, c = x.shape                # c == 3
    assert h % 2 == 0 and wd % 2 == 0
    xp = jnp.pad(x, ((0, 0), (3, 3), (3, 3), (0, 0)))          # (n, h+6, w+6, 3)
    hp, wp = h + 6, wd + 6
    xs = xp.reshape(n, hp // 2, 2, wp // 2, 2, c)
    xs = jnp.transpose(xs, (0, 1, 3, 2, 4, 5)).reshape(n, hp // 2, wp // 2, 4 * c)
    xs = xs.astype(jnp.bfloat16)
    # Weight remap (cout, 3, 7, 7) -> (cout, 12, 4, 4); tap (ky,kx)=(2*by+sy,
    # 2*bx+sx), channel order (sy, sx, c) matching the s2d layout above.
    cout = w.shape[0]
    wpad = jnp.pad(w, ((0, 0), (0, 0), (0, 1), (0, 1)))        # (cout, 3, 8, 8)
    w4 = wpad.reshape(cout, c, 4, 2, 4, 2)
    w4 = jnp.transpose(w4, (0, 3, 5, 1, 2, 4)).reshape(cout, 4 * c, 4, 4)
    return conv_bn(xs, w4, bn_scale, bn_shift, stride=1, pad=0, relu=True)


def basic_block(x, p, stride):
    out = conv_bn(x, p["conv1"], *p["bn1"], stride=stride, pad=1, relu=True)
    if "down_w" in p:
        identity = conv_bn(x, p["down_w"], *p["down_bn"], stride=stride, pad=0,
                           relu=False)
    else:
        identity = x
    # conv2 + bn2 + residual add + ReLU fused in the Pallas kernel.
    out = conv_bn(out, p["conv2"], *p["bn2"], stride=1, pad=1, relu=True,
                  residual=identity)
    return out


def rotation_cnn_forward(x_nchw, params):
    x = jnp.transpose(x_nchw, (0, 2, 3, 1))  # NCHW -> NHWC
    x = conv1_s2d(x, params["conv1"], *params["bn1"])
    # MaxPool 3x3 / stride 2 / pad 1 (glue, not the hot path).
    x = lax.reduce_window(x, jnp.asarray(-jnp.inf, x.dtype), lax.max,
                          (1, 3, 3, 1), (1, 2, 2, 1),
                          ((0, 0), (1, 1), (1, 1), (0, 0)))
    for name, stride in (("layer1", 1), ("layer2", 2), ("layer3", 2), ("layer4", 2)):
        blocks = params[name]
        x = basic_block(x, blocks[0], stride)
        x = basic_block(x, blocks[1], 1)
    x = jnp.mean(x.astype(jnp.float32), axis=(1, 2))  # adaptive avg pool -> [N, 512]
    # fc (replaced resnet.fc): Linear(512 -> num_classes). Single-block grid.
    w = params["fc_w"]  # (num_classes, 512)
    b = params["fc_b"]
    return matmul_bn_epilogue(x, w.T, bias=b, relu=False, out_dtype=jnp.float32)


# ---------------------------- parameter init ---------------------------------

def _fold_bn(gamma, beta, mean, var, eps=1e-5):
    scale = gamma / jnp.sqrt(var + eps)
    shift = beta - mean * scale
    return scale, shift


def _init_conv(key, cout, cin, kh, kw):
    fan_in = cin * kh * kw
    return jax.random.normal(key, (cout, cin, kh, kw), jnp.float32) * (2.0 / fan_in) ** 0.5


def _init_bn(key, c):
    k1, k2, k3, k4 = jax.random.split(key, 4)
    gamma = 1.0 + 0.1 * jax.random.normal(k1, (c,), jnp.float32)
    beta = 0.1 * jax.random.normal(k2, (c,), jnp.float32)
    mean = 0.1 * jax.random.normal(k3, (c,), jnp.float32)
    var = 1.0 + 0.1 * jax.random.uniform(k4, (c,), jnp.float32)
    return _fold_bn(gamma, beta, mean, var)


def init_params(key, num_classes=200):
    keys = iter(jax.random.split(key, 64))
    params = {}
    params["conv1"] = _init_conv(next(keys), 64, 3, 7, 7)
    params["bn1"] = _init_bn(next(keys), 64)

    def make_block(cin, cout, downsample):
        p = {
            "conv1": _init_conv(next(keys), cout, cin, 3, 3),
            "bn1": _init_bn(next(keys), cout),
            "conv2": _init_conv(next(keys), cout, cout, 3, 3),
            "bn2": _init_bn(next(keys), cout),
        }
        if downsample:
            p["down_w"] = _init_conv(next(keys), cout, cin, 1, 1)
            p["down_bn"] = _init_bn(next(keys), cout)
        return p

    cfg = [("layer1", 64, 64, False), ("layer2", 64, 128, True),
           ("layer3", 128, 256, True), ("layer4", 256, 512, True)]
    for name, cin, cout, ds in cfg:
        params[name] = [make_block(cin, cout, ds), make_block(cout, cout, False)]

    params["fc_w"] = 0.05 * jax.random.normal(next(keys), (num_classes, 512), jnp.float32)
    params["fc_b"] = jnp.zeros((num_classes,), jnp.float32)
    return params


# --------------------------------- main ---------------------------------------

if __name__ == "__main__":
    key = jax.random.PRNGKey(0)
    k_x, k_p = jax.random.split(key)
    # Small input consistent with ResNet-18: NCHW, 3 channels, 64x64 spatial.
    x = jax.random.normal(k_x, (2, 3, 64, 64), jnp.float32)
    params = init_params(k_p, num_classes=200)

    logits = rotation_cnn_forward(x, params)
    jax.block_until_ready(logits)
    assert logits.shape == (2, 200)
    assert bool(jnp.all(jnp.isfinite(logits)))
    print("KERNEL_OK")
</pallas_src>

<mosaic_0001>
module attributes {stable_mosaic.version = 11 : i64} {
  func.func @_mm_bn_kernel(%arg0: i32, %arg1: i32, %arg2: i32, %arg3: memref<256x256xbf16, #tpu.memory_space<vmem>>, %arg4: memref<256x128xbf16, #tpu.memory_space<vmem>>, %arg5: memref<1x128xf32, #tpu.memory_space<vmem>>, %arg6: memref<256x128xbf16, #tpu.memory_space<vmem>>, %arg7: memref<256x128xf32, #tpu.memory_space<vmem>>) attributes {dimension_semantics = [#tpu.dimension_semantics<parallel>, #tpu.dimension_semantics<parallel>, #tpu.dimension_semantics<arbitrary>], iteration_bounds = array<i64: 8, 1, 1>, scalar_prefetch = 0 : i64, scratch_operands = 1 : i64, tpu.core_type = #tpu.core_type<tc>, window_params = [{transform_indices = @transform_0, window_bounds = array<i64: 256, 256>}, {transform_indices = @transform_1, window_bounds = array<i64: 256, 128>}, {transform_indices = @transform_2, window_bounds = array<i64: 1, 128>}, {transform_indices = @transform_3, window_bounds = array<i64: 256, 128>}]} {
    %c0_i32 = arith.constant 0 : i32
    %0 = arith.cmpi eq, %arg2, %c0_i32 : i32
    %1 = arith.extui %0 : i1 to i32
    %c0_i32_0 = arith.constant 0 : i32
    %2 = arith.cmpi ne, %1, %c0_i32_0 : i32
    scf.if %2 {
      %cst_10 = arith.constant 0.000000e+00 : f32
      %12 = vector.broadcast %cst_10 : f32 to vector<256x128xf32>
      %c0_11 = arith.constant 0 : index
      %c0_12 = arith.constant 0 : index
      %13 = vector.load %arg7[%c0_11, %c0_12] : memref<256x128xf32, #tpu.memory_space<vmem>>, vector<256x128xf32>
      tpu.vector_store %arg7[%c0_11, %c0_12], %12 {strides = array<i32>} : memref<256x128xf32, #tpu.memory_space<vmem>>, vector<256x128xf32>,
    } else {
    }
    %c0 = arith.constant 0 : index
    %c0_1 = arith.constant 0 : index
    %3 = vector.load %arg7[%c0, %c0_1] : memref<256x128xf32, #tpu.memory_space<vmem>>, vector<256x128xf32>
    %c0_2 = arith.constant 0 : index
    %c0_3 = arith.constant 0 : index
    %4 = vector.load %arg3[%c0_2, %c0_3] : memref<256x256xbf16, #tpu.memory_space<vmem>>, vector<256x256xbf16>
    %c0_4 = arith.constant 0 : index
    %c0_5 = arith.constant 0 : index
    %5 = vector.load %arg4[%c0_4, %c0_5] : memref<256x128xbf16, #tpu.memory_space<vmem>>, vector<256x128xbf16>
    %cst = arith.constant dense<0.000000e+00> : vector<256x128xf32>
    %6 = tpu.matmul %4, %5, %cst {dimension_numbers = #tpu.dot_dimension_numbers<[1], [0], [0], [1], [0, 0, 1, 1], [], []>} : vector<256x256xbf16>, vector<256x128xbf16>, vector<256x128xf32> -> vector<256x128xf32>
    %7 = arith.addf %3, %6 : vector<256x128xf32>
    %c0_6 = arith.constant 0 : index
    %c0_7 = arith.constant 0 : index
    %8 = vector.load %arg7[%c0_6, %c0_7] : memref<256x128xf32, #tpu.memory_space<vmem>>, vector<256x128xf32>
    tpu.vector_store %arg7[%c0_6, %c0_7], %7 {strides = array<i32>} : memref<256x128xf32, #tpu.memory_space<vmem>>, vector<256x128xf32>,
    %c0_i32_8 = arith.constant 0 : i32
    %9 = arith.cmpi eq, %arg2, %c0_i32_8 : i32
    %10 = arith.extui %9 : i1 to i32
    %c0_i32_9 = arith.constant 0 : i32
    %11 = arith.cmpi ne, %10, %c0_i32_9 : i32
    scf.if %11 {
      %c0_10 = arith.constant 0 : index
      %c0_11 = arith.constant 0 : index
      %12 = vector.load %arg7[%c0_10, %c0_11] : memref<256x128xf32, #tpu.memory_space<vmem>>, vector<256x128xf32>
      %c0_12 = arith.constant 0 : index
      %c0_13 = arith.constant 0 : index
      %13 = vector.load %arg5[%c0_12, %c0_13] : memref<1x128xf32, #tpu.memory_space<vmem>>, vector<1x128xf32>
      %14 = vector.broadcast %13 : vector<1x128xf32> to vector<256x128xf32>
      %15 = arith.addf %12, %14 : vector<256x128xf32>
      %cst_14 = arith.constant 0.000000e+00 : f32
      %16 = vector.broadcast %cst_14 : f32 to vector<256x128xf32>
      %17 = arith.maximumf %15, %16 : vector<256x128xf32>
      %18 = arith.truncf %17 : vector<256x128xf32> to vector<256x128xbf16>
      %c0_15 = arith.constant 0 : index
      %c0_16 = arith.constant 0 : index
      %19 = vector.load %arg6[%c0_15, %c0_16] : memref<256x128xbf16, #tpu.memory_space<vmem>>, vector<256x128xbf16>
      tpu.vector_store %arg6[%c0_15, %c0_16], %18 {strides = array<i32>} : memref<256x128xbf16, #tpu.memory_space<vmem>>, vector<256x128xbf16>,
    } else {
    }
    return
  }
  func.func @transform_0(%arg0: i32, %arg1: i32, %arg2: i32) -> (i32, i32) {
    %c0_i32 = arith.constant 0 : i32
    return %arg0, %arg2 : i32, i32
  }
  func.func @transform_1(%arg0: i32, %arg1: i32, %arg2: i32) -> (i32, i32) {
    %c0_i32 = arith.constant 0 : i32
    return %arg2, %arg1 : i32, i32
  }
  func.func @transform_2(%arg0: i32, %arg1: i32, %arg2: i32) -> (i32, i32) {
    %c0_i32 = arith.constant 0 : i32
    %c0_i32_0 = arith.constant 0 : i32
    return %c0_i32, %arg1 : i32, i32
  }
  func.func @transform_3(%arg0: i32, %arg1: i32, %arg2: i32) -> (i32, i32) {
    %c0_i32 = arith.constant 0 : i32
    return %arg0, %arg1 : i32, i32
  }
}

</mosaic_0001>

<bundles_post_ra>
// kernel: tpu_custom_call.1
= control target key start
LH: loop header
LB: loop body
LE: loop exit
PB: predicated region body
PF: predicated region fallthrough
CT: control target
= control target key end

     0   :  { %s2090_s0 = inlined_call_operand.hbm [shape: bf16[2048,256], index: 0, kind: input, shape index: {}]   ;;  %s2091_s1 = inlined_call_operand.hbm [shape: bf16[256,128], index: 1, kind: input, shape index: {}]   ;;  %s2092_s2 = inlined_call_operand.vmem [shape: f32[1,128], index: 2, kind: input, shape index: {}]   ;;  %s2093_s3 = inlined_call_operand.hbm [shape: bf16[2048,128], index: 3, kind: output, shape index: {}]  }
   0x1   :  { %2094 = sst [smem:[#allocation12_spill]] %s2091_s1 }
   0x2   :  { %8 = vsyncpa [#allocation4], 0 }
   0x3   :  { %10 = vsyncpa [#allocation4 + $0x1], 0 }
   0x4   :  { %11 = vsyncpa [#allocation7], 0 }
   0x5   :  { %12 = vsyncpa [#allocation5], 0 }
   0x6   :  { %14 = vsyncpa [#allocation5 + $0x1], 0  ;;  %s1820_s12 = smov 0   ;;  %s1822_s13 = smov 0  }
   0x7   :  { %s1824_s14 = smov 0   ;;  %s1826_s15 = smov 0  }
   0x8   :  { %s1828_s16 = smov 0   ;;  %s1830_s17 = smov 0  }
   0x9 LB: > { %s1192_s18 = sadd.s32 4294967295, %s1791_s17   ;;  %s1193_s19 = sadd.s32 4294967294, %s1791_s17   ;;  %s1791_s17 = sphi %s1830_s17, %s20_s17   ;;  %s1787_s16 = sphi %s1828_s16, %s2107_s16   ;;  %s1783_s15 = sphi %s1826_s15, %s2106_s15   ;;  %s1779_s14 = sphi %s1824_s14, %s2105_s14   ;;  %s1775_s13 = sphi %s1822_s13, %s2104_s13   ;;  %s1771_s12 = sphi %s1820_s12, %s2103_s12  }
   0xa   : > { %p61_p0 = scmp.ne.s32.totalorder %s1775_s13, %s1771_s12  ;;  %p1854_p1 = scmp.eq.s32.totalorder %s1192_s18, 0 }
   0xb   : > { %p1858_p2 = scmp.eq.s32.totalorder %s1192_s18, 7  ;;  %p147_p3 = scmp.eq.s32.totalorder %s1193_s19, 7 }
   0xc   : > { %p1864_p4 = por %p1854_p1, %p61_p0  ;;  %p1194_p5 = scmp.ge.s32.totalorder %s1791_s17, 1 }
   0xd   : > { %p1869_p6 = por %p147_p3, %p61_p0  ;;  %p154_p7 = scmp.lt.s32.totalorder %s1791_s17, 9 }
   0xe   : > { %s2099_s1 = sld [smem:[#allocation12_spill]]  ;;  %s1793_s28 = smov [#allocation6]  }
   0xf   : > { %p1877_p8 = pnand %p1194_p5, %p154_p7  ;;  %s171_s29 = sshll.u32 %s1793_s28, 4  ;;  %s172_s29 = int_to_ptr.vmem [resolvable:$true] %s171_s29 }
  0x10   : > { %s1794_s30 = smov 64   ;;  %s1795_s4 = smov 4  }
  0x11   : > { %p1573_p9 = pneg %p1877_p8  ;;  %s39_s5 = sadd.s32 1, %s1787_s16 }
  0x12   : > { %p41_p11 = scmp.ge.s32.totalorder %s39_s5, 8  ;;  %s48_s6 = sadd.s32 1, %s1779_s14 }
  0x13   : > { %p1574_p10 = pnand %p1573_p9, %p1854_p1  ;;  %p55_p12 = scmp.ne.s32.totalorder %s1779_s14, %s1775_s13 }
  0x14   : > { %s169_s26 = sshll.u32 %s2099_s1, 4  ;;  %p56_p13 = scmp.eq.s32.totalorder %s1791_s17, 0  ;;  %s170_s26 = int_to_ptr.hbm [resolvable:$true] %s169_s26 }
  0x15   : > { %1576 = dma.hbm_to_vmem [thread:$0]  (!%p1574_p10), %s170_s26, 2048, %s172_s29, [#allocation7], %s1794_s30, %s1794_s30, %s1795_s4  }
  0x16   : > { %s2109_s5 = smov (%p41_p11, %s39_s5), 0  ;;  %p1892_p0 = por %p56_p13, %p55_p12 }
  0x17   : > { %p1898_p3 = por %p1858_p2, %p55_p12  ;;  %s43_s9 = ssub.s32 %s1787_s16, %s2109_s5 }
  0x18   : > { %p1586_p5 = scmp.lt.s32.totalorder %s1791_s17, 8  ;;  %p46_p7 = scmp.eq.s32.totalorder %s43_s9, 0 }
  0x19   : > { %s191_s10 = sand.u32 1, %s1779_s14   ;;  %s1404_s19 = sshll.u32 %s1787_s16, 8 }
  0x1a   : > { %s1198_s11 = sshll.u32 %s191_s10, 8  ;;  %s203_s26 = scalar_lea.hbm %s2090_s0, %s1404_s19 }
  0x1b   : > { %s1907_s18 = scalar_select %p46_p7, %s1779_s14, %s48_s6  }
  0x1c   : > { %s195_s28 = scalar_lea.vmem [#allocation3], %s1198_s11  ;;  %s204_s21 = sshll.u32 %s203_s26, 4  ;;  %s205_s21 = int_to_ptr.hbm [resolvable:$true] %s204_s21 }
  0x1d   : > { %s206_s29 = sshll.u32 %s195_s28, 4  ;;  %p1578_p2 = pnand %p1586_p5, %p1892_p0  ;;  %s207_s29 = int_to_ptr.vmem [resolvable:$true] %s206_s29 }
  0x1e   : > { %s192_s30 = scalar_lea.sflag [#allocation4], %s191_s10  ;;  %s1796_s4 = smov 128  }
  0x1f   : > { %s1797_s1 = smov 8   ;;  %218 = sbr.rel (%p1877_p8) target bundleno = 336 (0x150), region = 32 }
  0x20   : > { %1580 = dma.hbm_to_vmem [thread:$0]  (!%p1578_p2), %s205_s21, 4096, %s207_s29, %s192_s30, %s1796_s4, %s1796_s4, %s1797_s1  }
  0x21   : > { %s1918_s6 = sand.u32 (!%p1877_p8), 1, %s1775_s13  }
  0x22   : > { %s1203_s9 = sshll.u32 (!%p1877_p8), %s1918_s6, 8  ;;  %s221_s11 = scalar_lea.sflag (!%p1877_p8), [#allocation4], %s1918_s6 }
  0x23   : > { %s1922_s19 = scalar_lea.vmem (!%p1877_p8), [#allocation3], %s1203_s9 }
  0x24   : > { %1758 = dma.done.wait (%p1864_p4), %s221_s11, 4096  }
  0x25   : > { %1760 = vsyncadd (%p1864_p4), %s221_s11, 4294963200 }
  0x26   : > { %1762 = dma.done.wait (%p1854_p1), [#allocation7], 2048  }
  0x27   : > { %1764 = vsyncadd (%p1854_p1), [#allocation7], 4294965248  ;;  %v1444_v0 = vld [vmem:[#allocation6 + $0x38] sm:$0xff]  ;;  %v1443_v2 = vld [vmem:[#allocation6 + $0x30] sm:$0xff]  ;;  %s1205_s22 = sshll.u32 %s1918_s6, 7  ;;  %s1453_s7 = sshll.u32 %s1783_s15, 7 }
  0x28   : > { %v1452_v1 = vld [vmem:[#allocation6 + $0x78] sm:$0xff]  ;;  %651 = vmatpush.bf16.msra.mxu0 %v1444_v0  ;;  %1549 = vmatpush.bf16.msra.mxu2 %v1444_v0  ;;  %v1451_v3 = vld [vmem:[#allocation6 + $0x70] sm:$0xff]  ;;  %v1442_v4 = vld [vmem:[#allocation6 + $0x28] sm:$0xff]  ;;  %s2005_s27 = scalar_lea.vmem [#allocation8], %s1205_s22  ;;  %s1073_s25 = scalar_lea.hbm %s2093_s3, %s1453_s7 }
  0x29   : > { %740 = vmatpush.bf16.msra.mxu1 %v1452_v1  ;;  %1557 = vmatpush.bf16.msra.mxu3 %v1452_v1  ;;  %v1450_v5 = vld [vmem:[#allocation6 + $0x68] sm:$0xff]  ;;  %v1441_v6 = vld [vmem:[#allocation6 + $0x20] sm:$0xff]  ;;  %v1440_v8 = vld [vmem:[#allocation6 + $0x18] sm:$0xff]  ;;  %s1074_s26 = sshll.u32 %s2005_s27, 4  ;;  %s1076_s15 = sshll.u32 %s1073_s25, 4  ;;  %s1075_s26 = int_to_ptr.vmem [resolvable:$true] %s1074_s26  ;;  %s1077_s15 = int_to_ptr.hbm [resolvable:$true] %s1076_s15 }
  0x2a   : > { %v1449_v7 = vld [vmem:[#allocation6 + $0x60] sm:$0xff]  ;;  %v1448_v9 = vld [vmem:[#allocation6 + $0x58] sm:$0xff]  ;;  %v1439_v10 = vld [vmem:[#allocation6 + $0x10] sm:$0xff]  ;;  %s1061_s28 = scalar_lea.sflag [#allocation5], %s1918_s6  ;;  %s1719_s29 = sshra.s32 %s1077_s15, 4  ;;  %s1720_s29 = int_to_ptr.hbm [resolvable:$true] %s1719_s29 }
  0x2b   : > { %v1447_v11 = vld [vmem:[#allocation6 + $0x50] sm:$0xff]  ;;  %v1438_v12 = vld [vmem:[#allocation6 + $0x8] sm:$0xff]  ;;  %v1437_v14 = vld [vmem:[#allocation6] sm:$0xff]  ;;  %s1721_s21 = scalar_lea.hbm %s1720_s29, 128  ;;  %s1725_s9 = scalar_lea.hbm %s2093_s3, 1024 }
  0x2c   : > { %652 = vmatpush.bf16.msra.mxu0 %v1443_v2  ;;  %1550 = vmatpush.bf16.msra.mxu2 %v1443_v2  ;;  %v1446_v13 = vld [vmem:[#allocation6 + $0x48] sm:$0xff]  ;;  %v1445_v15 = vld [vmem:[#allocation6 + $0x40] sm:$0xff]  ;;  %v1216_v28 = vld [vmem:[%s1922_s19 + $0x10] sm:$0xf]  ;;  %p1722_p1 = scmp.ne.s32.totalorder %s1720_s29, %s1721_s21  ;;  %p1726_p9 = scmp.lt.s32.totalorder %s1720_s29, %s2093_s3 }
  0x2d   : > { %741 = vmatpush.bf16.msra.mxu1 %v1451_v3  ;;  %1558 = vmatpush.bf16.msra.mxu3 %v1451_v3  ;;  %v1208_v16 = vld [vmem:[%s1922_s19] sm:$0xf]  ;;  %v1406_v17 = vld [vmem:[%s1922_s19 + $0x4] sm:$0xf0]  ;;  %v1405_v20 = vld [vmem:[%s1922_s19 + $0x4] sm:$0xf]  ;;  %p1727_p10 = scmp.lt.s32.totalorder %s1725_s9, %s1721_s21 }
  0x2e   : > { %v1272_v18 = vld [vmem:[%s1922_s19 + $0x80] sm:$0xf]  ;;  %v1422_v19 = vld [vmem:[%s1922_s19 + $0x84] sm:$0xf0]  ;;  %v1210_v21 = vld [vmem:[%s1922_s19 + $0x8] sm:$0xf0]  ;;  %v1209_v24 = vor.u32 %v1406_v17, %v1208_v16  ;;  %p1723_p4 = pnand %p1722_p1, %p1898_p3 }
  0x2f   : > { %v1421_v22 = vld [vmem:[%s1922_s19 + $0x84] sm:$0xf]  ;;  %v1274_v23 = vld [vmem:[%s1922_s19 + $0x88] sm:$0xf0]  ;;  %v1273_v25 = vor.u32 %v1422_v19, %v1272_v18  ;;  %v1213_v26 = vor.u32 %v1405_v20, %v1210_v21  ;;  %v1408_v29 = vld [vmem:[%s1922_s19 + $0x14] sm:$0xf0]  ;;  %p1728_p11 = por %p1727_p10, %p1726_p9 }
  0x30   : > { %653 = vmatpush.bf16.msra.mxu0 %v1442_v4  ;;  %1551 = vmatpush.bf16.msra.mxu2 %v1442_v4  ;;  %v1277_v27 = vor.u32 %v1421_v22, %v1274_v23  ;;  %v1280_v30 = vld [vmem:[%s1922_s19 + $0x90] sm:$0xf]  ;;  %v1424_v31 = vld [vmem:[%s1922_s19 + $0x94] sm:$0xf0]  ;;  %v1407_v32 = vld [vmem:[%s1922_s19 + $0x14] sm:$0xf]  ;;  %v1217_v36 = vor.u32 %v1408_v29, %v1216_v28  ;;  %p1724_p8 = pneg %p1723_p4 }
  0x31   : > { %742 = vmatpush.bf16.msra.mxu1 %v1450_v5  ;;  %1559 = vmatpush.bf16.msra.mxu3 %v1450_v5  ;;  %v1218_v33 = vld [vmem:[%s1922_s19 + $0x18] sm:$0xf0]  ;;  %v1423_v34 = vld [vmem:[%s1922_s19 + $0x94] sm:$0xf]  ;;  %v1281_v37 = vor.u32 %v1424_v31, %v1280_v30  ;;  %v1224_v40 = vld [vmem:[%s1922_s19 + $0x20] sm:$0xf] }
  0x32   : > { %v1282_v35 = vld [vmem:[%s1922_s19 + $0x98] sm:$0xf0]  ;;  %v1221_v38 = vor.u32 %v1407_v32, %v1218_v33  ;;  %v1410_v41 = vld [vmem:[%s1922_s19 + $0x24] sm:$0xf0]  ;;  %v1288_v42 = vld [vmem:[%s1922_s19 + $0xa0] sm:$0xf]  ;;  %p1729_p12 = pnand %p1728_p11, %p1724_p8 }
  0x33   : > { %v1285_v39 = vor.u32 %v1423_v34, %v1282_v35  ;;  %v1426_v43 = vld [vmem:[%s1922_s19 + $0xa4] sm:$0xf0]  ;;  %v1409_v44 = vld [vmem:[%s1922_s19 + $0x24] sm:$0xf]  ;;  %v1226_v45 = vld [vmem:[%s1922_s19 + $0x28] sm:$0xf0]  ;;  %v1225_v48 = vor.u32 %v1410_v41, %v1224_v40 }
  0x34   : > { %654 = vmatpush.bf16.msra.mxu0 %v1441_v6  ;;  %1552 = vmatpush.bf16.msra.mxu2 %v1441_v6  ;;  %v1425_v46 = vld [vmem:[%s1922_s19 + $0xa4] sm:$0xf]  ;;  %v1290_v47 = vld [vmem:[%s1922_s19 + $0xa8] sm:$0xf0]  ;;  %v1289_v49 = vor.u32 %v1426_v43, %v1288_v42  ;;  %v1229_v50 = vor.u32 %v1409_v44, %v1226_v45  ;;  %v1232_v52 = vld [vmem:[%s1922_s19 + $0x30] sm:$0xf] }
  0x35   : > { %743 = vmatpush.bf16.msra.mxu1 %v1449_v7  ;;  %1560 = vmatpush.bf16.msra.mxu3 %v1449_v7  ;;  %v1293_v51 = vor.u32 %v1425_v46, %v1290_v47  ;;  %v1412_v53 = vld [vmem:[%s1922_s19 + $0x34] sm:$0xf0]  ;;  %v1296_v54 = vld [vmem:[%s1922_s19 + $0xb0] sm:$0xf]  ;;  %v1411_v56 = vld [vmem:[%s1922_s19 + $0x34] sm:$0xf] }
  0x36   : > { %v1428_v55 = vld [vmem:[%s1922_s19 + $0xb4] sm:$0xf0]  ;;  %v1234_v57 = vld [vmem:[%s1922_s19 + $0x38] sm:$0xf0]  ;;  %v1427_v58 = vld [vmem:[%s1922_s19 + $0xb4] sm:$0xf]  ;;  %v1233_v60 = vor.u32 %v1412_v53, %v1232_v52 }
  0x37   : > { %v1298_v59 = vld [vmem:[%s1922_s19 + $0xb8] sm:$0xf0]  ;;  %v1297_v61 = vor.u32 %v1428_v55, %v1296_v54  ;;  %v1237_v62 = vor.u32 %v1411_v56, %v1234_v57  ;;  %v1240_v0 = vld [vmem:[%s1922_s19 + $0x40] sm:$0xf]  ;;  %v1414_v1 = vld [vmem:[%s1922_s19 + $0x44] sm:$0xf0] }
  0x38   : > { %655 = vmatpush.bf16.msra.mxu0 %v1440_v8  ;;  %1553 = vmatpush.bf16.msra.mxu2 %v1440_v8  ;;  %v1301_v63 = vor.u32 %v1427_v58, %v1298_v59  ;;  %v1304_v2 = vld [vmem:[%s1922_s19 + $0xc0] sm:$0xf]  ;;  %v1430_v3 = vld [vmem:[%s1922_s19 + $0xc4] sm:$0xf0]  ;;  %v1413_v4 = vld [vmem:[%s1922_s19 + $0x44] sm:$0xf]  ;;  %v1241_v8 = vor.u32 %v1414_v1, %v1240_v0 }
  0x39   : > { %744 = vmatpush.bf16.msra.mxu1 %v1448_v9  ;;  %1561 = vmatpush.bf16.msra.mxu3 %v1448_v9  ;;  %v1242_v5 = vld [vmem:[%s1922_s19 + $0x48] sm:$0xf0]  ;;  %v1429_v6 = vld [vmem:[%s1922_s19 + $0xc4] sm:$0xf]  ;;  %v1305_v9 = vor.u32 %v1430_v3, %v1304_v2  ;;  %v1415_v16 = vld [vmem:[%s1922_s19 + $0x54] sm:$0xf] }
  0x3a   : > { %v1306_v7 = vld [vmem:[%s1922_s19 + $0xc8] sm:$0xf0]  ;;  %v1250_v17 = vld [vmem:[%s1922_s19 + $0x58] sm:$0xf0]  ;;  %v1431_v18 = vld [vmem:[%s1922_s19 + $0xd4] sm:$0xf] }
  0x3b   : > { %v1314_v19 = vld [vmem:[%s1922_s19 + $0xd8] sm:$0xf0]  ;;  %v1253_v22 = vor.u32 %v1415_v16, %v1250_v17  ;;  %v1417_v28 = vld [vmem:[%s1922_s19 + $0x64] sm:$0xf]  ;;  %v1258_v29 = vld [vmem:[%s1922_s19 + $0x68] sm:$0xf0] }
  0x3c   : > { %656 = vmatpush.bf16.msra.mxu0 %v1439_v10  ;;  %1554 = vmatpush.bf16.msra.mxu2 %v1439_v10  ;;  %v1245_v10 = vor.u32 %v1413_v4, %v1242_v5  ;;  %v1317_v23 = vor.u32 %v1431_v18, %v1314_v19  ;;  %v1433_v30 = vld [vmem:[%s1922_s19 + $0xe4] sm:$0xf]  ;;  %v1322_v31 = vld [vmem:[%s1922_s19 + $0xe8] sm:$0xf0]  ;;  %v1261_v34 = vor.u32 %v1417_v28, %v1258_v29  ;;  %v1419_v40 = vld [vmem:[%s1922_s19 + $0x74] sm:$0xf] }
  0x3d   : > { %745 = vmatpush.bf16.msra.mxu1 %v1447_v11  ;;  %1562 = vmatpush.bf16.msra.mxu3 %v1447_v11  ;;  %v1309_v11 = vor.u32 %v1429_v6, %v1306_v7  ;;  %v1325_v35 = vor.u32 %v1433_v30, %v1322_v31  ;;  %v1266_v41 = vld [vmem:[%s1922_s19 + $0x78] sm:$0xf0]  ;;  %v1435_v42 = vld [vmem:[%s1922_s19 + $0xf4] sm:$0xf] }
  0x3e   : > { %v1330_v43 = vld [vmem:[%s1922_s19 + $0xf8] sm:$0xf0]  ;;  %v1269_v46 = vor.u32 %v1419_v40, %v1266_v41 }
  0x3f   : > { %v1333_v47 = vor.u32 %v1435_v42, %v1330_v43 }
  0x40   : > { %657 = vmatpush.bf16.msra.mxu0 %v1438_v12  ;;  %1555 = vmatpush.bf16.msra.mxu2 %v1438_v12  ;;  %v1248_v12 = vld [vmem:[%s1922_s19 + $0x50] sm:$0xf] }
  0x41   : > { %746 = vmatpush.bf16.msra.mxu1 %v1446_v13  ;;  %1563 = vmatpush.bf16.msra.mxu3 %v1446_v13  ;;  %v1416_v13 = vld [vmem:[%s1922_s19 + $0x54] sm:$0xf0] }
  0x42   : > { %v1249_v20 = vor.u32 %v1416_v13, %v1248_v12 }
  0x44   : > { %658 = vmatpush.bf16.msra.mxu0 %v1437_v14  ;;  %1556 = vmatpush.bf16.msra.mxu2 %v1437_v14  ;;  %v1312_v14 = vld [vmem:[%s1922_s19 + $0xd0] sm:$0xf] }
  0x45   : > { %747 = vmatpush.bf16.msra.mxu1 %v1445_v15  ;;  %1564 = vmatpush.bf16.msra.mxu3 %v1445_v15  ;;  %v1432_v15 = vld [vmem:[%s1922_s19 + $0xd4] sm:$0xf0] }
  0x46   : > { %v1313_v21 = vor.u32 %v1432_v15, %v1312_v14 }
  0x47   : > { %659 = vmatmul.bf16.vlgmr.msra.gmra.mxu0 %v1209_v24  ;;  %699 = vmatmul.bf16.vlgmr.msra.gmra.mxu2 %v1273_v25  ;;  %v1256_v24 = vld [vmem:[%s1922_s19 + $0x60] sm:$0xf]  ;;  %v1418_v25 = vld [vmem:[%s1922_s19 + $0x64] sm:$0xf0] }
  0x48   : > { %748 = vmatmul.bf16.vlgmr.msra.gmra.mxu1 %v1213_v26  ;;  %788 = vmatmul.bf16.vlgmr.msra.gmra.mxu3 %v1277_v27  ;;  %v1320_v26 = vld [vmem:[%s1922_s19 + $0xe0] sm:$0xf]  ;;  %v1434_v27 = vld [vmem:[%s1922_s19 + $0xe4] sm:$0xf0]  ;;  %v1257_v32 = vor.u32 %v1418_v25, %v1256_v24 }
  0x49   : > { %v1321_v33 = vor.u32 %v1434_v27, %v1320_v26 }
  0x57   : > { %664 = vmatmul.bf16.gmra.mxu0 %v1217_v36  ;;  %704 = vmatmul.bf16.gmra.mxu2 %v1281_v37  ;;  %v1264_v36 = vld [vmem:[%s1922_s19 + $0x70] sm:$0xf]  ;;  %v1420_v37 = vld [vmem:[%s1922_s19 + $0x74] sm:$0xf0] }
  0x58   : > { %753 = vmatmul.bf16.gmra.mxu1 %v1221_v38  ;;  %793 = vmatmul.bf16.gmra.mxu3 %v1285_v39  ;;  %v1328_v38 = vld [vmem:[%s1922_s19 + $0xf0] sm:$0xf]  ;;  %v1436_v39 = vld [vmem:[%s1922_s19 + $0xf4] sm:$0xf0]  ;;  %v1265_v44 = vor.u32 %v1420_v37, %v1264_v36 }
  0x59   : > { %v1329_v45 = vor.u32 %v1436_v39, %v1328_v38 }
  0x67   : > { %669 = vmatmul.bf16.gmra.mxu0 %v1225_v48  ;;  %709 = vmatmul.bf16.gmra.mxu2 %v1289_v49 }
  0x68   : > { %758 = vmatmul.bf16.gmra.mxu1 %v1229_v50  ;;  %798 = vmatmul.bf16.gmra.mxu3 %v1293_v51  ;;  %v1999_v51 = vld [vmem:[%s2092_s2] ss:$0 sm:$0xff] }
  0x77   : > { %674 = vmatmul.bf16.gmra.mxu0 %v1233_v60  ;;  %714 = vmatmul.bf16.gmra.mxu2 %v1297_v61 }
  0x78   : > { %763 = vmatmul.bf16.gmra.mxu1 %v1237_v62  ;;  %803 = vmatmul.bf16.gmra.mxu3 %v1301_v63 }
  0x87   : > { %679 = vmatmul.bf16.gmra.mxu0 %v1241_v8  ;;  %719 = vmatmul.bf16.gmra.mxu2 %v1305_v9 }
  0x88   : > { %768 = vmatmul.bf16.gmra.mxu1 %v1245_v10  ;;  %808 = vmatmul.bf16.gmra.mxu3 %v1309_v11 }
  0x97   : > { %684 = vmatmul.bf16.gmra.mxu0 %v1249_v20  ;;  %724 = vmatmul.bf16.gmra.mxu2 %v1313_v21 }
  0x98   : > { %773 = vmatmul.bf16.gmra.mxu1 %v1253_v22  ;;  %813 = vmatmul.bf16.gmra.mxu3 %v1317_v23 }
  0xa7   : > { %689 = vmatmul.bf16.gmra.mxu0 %v1257_v32  ;;  %729 = vmatmul.bf16.gmra.mxu2 %v1321_v33 }
  0xa8   : > { %778 = vmatmul.bf16.gmra.mxu1 %v1261_v34  ;;  %818 = vmatmul.bf16.gmra.mxu3 %v1325_v35 }
  0xb7   : > { %694 = vmatmul.bf16.gmra.mxu0 %v1265_v44  ;;  %734 = vmatmul.bf16.gmra.mxu2 %v1329_v45 }
  0xb8   : > { %783 = vmatmul.bf16.gmra.mxu1 %v1269_v46  ;;  %823 = vmatmul.bf16.gmra.mxu3 %v1333_v47 }
  0xc4   : > { %v660_v48 = vpop.f32.mrf.mxu0 }
  0xc5   : > { %v749_v49 = vpop.f32.mrf.mxu1 }
  0xc6   : > { %v750_v50 = vadd.f32 %v749_v49, %v660_v48 }
  0xc8   : > { %v932_v56 = vadd.f32 %v1999_v51, %v750_v50 }
  0xca   : > { %v700_v52 = vpop.f32.mrf.mxu2  ;;  %v964_v60 = vmax.f32 %v932_v56, 0.0 }
  0xcb   : > { %v789_v53 = vpop.f32.mrf.mxu3 }
  0xcc   : > { %v662_v54 = vpop.f32.mrf.mxu0  ;;  %v790_v58 = vadd.f32 %v789_v53, %v700_v52 }
  0xcd   : > { %v751_v55 = vpop.f32.mrf.mxu1 }
  0xce   : > { %v752_v57 = vadd.f32 %v751_v55, %v662_v54  ;;  %v948_v0 = vadd.f32 %v1999_v51, %v790_v58 }
  0xd0   : > { %v933_v59 = vadd.f32 %v1999_v51, %v752_v57  ;;  %v980_v6 = vmax.f32 %v948_v0, 0.0 }
  0xd2   : > { %v965_v61 = vmax.f32 %v933_v59, 0.0  ;;  %v702_v62 = vpop.f32.mrf.mxu2 }
  0xd3   : > { %v791_v63 = vpop.f32.mrf.mxu3 }
  0xd4   : > { %v1457_v1 = vpack.c.bf16 %v965_v61, %v964_v60  ;;  %v792_v2 = vadd.f32 %v791_v63, %v702_v62  ;;  %v665_v3 = vpop.f32.mrf.mxu0 }
  0xd5   : > { %v754_v4 = vpop.f32.mrf.mxu1 }
  0xd6   : > { %1458 = vst [vmem:[%s2005_s27] sm:$0xff] %v1457_v1   ;;  %v949_v5 = vadd.f32 %v1999_v51, %v792_v2  ;;  %v755_v9 = vadd.f32 %v754_v4, %v665_v3 }
  0xd8   : > { %v981_v7 = vmax.f32 %v949_v5, 0.0  ;;  %v934_v14 = vadd.f32 %v1999_v51, %v755_v9 }
  0xda   : > { %v1497_v8 = vpack.c.bf16 %v981_v7, %v980_v6  ;;  %v705_v10 = vpop.f32.mrf.mxu2  ;;  %v966_v18 = vmax.f32 %v934_v14, 0.0 }
  0xdb   : > { %v794_v11 = vpop.f32.mrf.mxu3 }
  0xdc   : > { %1541 = vst [vmem:[%s2005_s27 + $0x40] sm:$0xff] %v1497_v8   ;;  %v667_v12 = vpop.f32.mrf.mxu0  ;;  %v795_v16 = vadd.f32 %v794_v11, %v705_v10 }
  0xdd   : > { %v756_v13 = vpop.f32.mrf.mxu1 }
  0xde   : > { %v757_v15 = vadd.f32 %v756_v13, %v667_v12  ;;  %v950_v22 = vadd.f32 %v1999_v51, %v795_v16 }
  0xe0   : > { %v935_v17 = vadd.f32 %v1999_v51, %v757_v15  ;;  %v982_v28 = vmax.f32 %v950_v22, 0.0 }
  0xe2   : > { %v967_v19 = vmax.f32 %v935_v17, 0.0  ;;  %v707_v20 = vpop.f32.mrf.mxu2 }
  0xe3   : > { %v796_v21 = vpop.f32.mrf.mxu3 }
  0xe4   : > { %v1462_v23 = vpack.c.bf16 %v967_v19, %v966_v18  ;;  %v797_v24 = vadd.f32 %v796_v21, %v707_v20  ;;  %v670_v25 = vpop.f32.mrf.mxu0 }
  0xe5   : > { %v759_v26 = vpop.f32.mrf.mxu1 }
  0xe6   : > { %1534 = vst [vmem:[%s2005_s27 + $0x8] sm:$0xff] %v1462_v23   ;;  %v951_v27 = vadd.f32 %v1999_v51, %v797_v24  ;;  %v760_v31 = vadd.f32 %v759_v26, %v670_v25 }
  0xe8   : > { %v983_v29 = vmax.f32 %v951_v27, 0.0  ;;  %v936_v36 = vadd.f32 %v1999_v51, %v760_v31 }
  0xea   : > { %v1502_v30 = vpack.c.bf16 %v983_v29, %v982_v28  ;;  %v710_v32 = vpop.f32.mrf.mxu2  ;;  %v968_v40 = vmax.f32 %v936_v36, 0.0 }
  0xeb   : > { %v799_v33 = vpop.f32.mrf.mxu3 }
  0xec   : > { %1542 = vst [vmem:[%s2005_s27 + $0x48] sm:$0xff] %v1502_v30   ;;  %v672_v34 = vpop.f32.mrf.mxu0  ;;  %v800_v38 = vadd.f32 %v799_v33, %v710_v32 }
  0xed   : > { %v761_v35 = vpop.f32.mrf.mxu1 }
  0xee   : > { %v762_v37 = vadd.f32 %v761_v35, %v672_v34  ;;  %v952_v44 = vadd.f32 %v1999_v51, %v800_v38 }
  0xf0   : > { %v937_v39 = vadd.f32 %v1999_v51, %v762_v37  ;;  %v984_v50 = vmax.f32 %v952_v44, 0.0 }
  0xf2   : > { %v969_v41 = vmax.f32 %v937_v39, 0.0  ;;  %v712_v42 = vpop.f32.mrf.mxu2 }
  0xf3   : > { %v801_v43 = vpop.f32.mrf.mxu3 }
  0xf4   : > { %v1467_v45 = vpack.c.bf16 %v969_v41, %v968_v40  ;;  %v802_v46 = vadd.f32 %v801_v43, %v712_v42  ;;  %v675_v47 = vpop.f32.mrf.mxu0 }
  0xf5   : > { %v764_v48 = vpop.f32.mrf.mxu1 }
  0xf6   : > { %1535 = vst [vmem:[%s2005_s27 + $0x10] sm:$0xff] %v1467_v45   ;;  %v953_v49 = vadd.f32 %v1999_v51, %v802_v46  ;;  %v765_v54 = vadd.f32 %v764_v48, %v675_v47 }
  0xf8   : > { %v985_v52 = vmax.f32 %v953_v49, 0.0  ;;  %v938_v59 = vadd.f32 %v1999_v51, %v765_v54 }
  0xfa   : > { %v1507_v53 = vpack.c.bf16 %v985_v52, %v984_v50  ;;  %v715_v55 = vpop.f32.mrf.mxu2  ;;  %v970_v63 = vmax.f32 %v938_v59, 0.0 }
  0xfb   : > { %v804_v56 = vpop.f32.mrf.mxu3 }
  0xfc   : > { %1543 = vst [vmem:[%s2005_s27 + $0x50] sm:$0xff] %v1507_v53   ;;  %v677_v57 = vpop.f32.mrf.mxu0  ;;  %v805_v61 = vadd.f32 %v804_v56, %v715_v55 }
  0xfd   : > { %v766_v58 = vpop.f32.mrf.mxu1 }
  0xfe   : > { %v767_v60 = vadd.f32 %v766_v58, %v677_v57  ;;  %v954_v3 = vadd.f32 %v1999_v51, %v805_v61 }
 0x100   : > { %v939_v62 = vadd.f32 %v1999_v51, %v767_v60  ;;  %v986_v9 = vmax.f32 %v954_v3, 0.0 }
 0x102   : > { %v971_v0 = vmax.f32 %v939_v62, 0.0  ;;  %v717_v1 = vpop.f32.mrf.mxu2 }
 0x103   : > { %v806_v2 = vpop.f32.mrf.mxu3 }
 0x104   : > { %v1472_v4 = vpack.c.bf16 %v971_v0, %v970_v63  ;;  %v807_v5 = vadd.f32 %v806_v2, %v717_v1  ;;  %v680_v6 = vpop.f32.mrf.mxu0 }
 0x105   : > { %v769_v7 = vpop.f32.mrf.mxu1 }
 0x106   : > { %1536 = vst [vmem:[%s2005_s27 + $0x18] sm:$0xff] %v1472_v4   ;;  %v955_v8 = vadd.f32 %v1999_v51, %v807_v5  ;;  %v770_v12 = vadd.f32 %v769_v7, %v680_v6 }
 0x108   : > { %v987_v10 = vmax.f32 %v955_v8, 0.0  ;;  %v940_v17 = vadd.f32 %v1999_v51, %v770_v12 }
 0x10a   : > { %v1512_v11 = vpack.c.bf16 %v987_v10, %v986_v9  ;;  %v720_v13 = vpop.f32.mrf.mxu2  ;;  %v972_v21 = vmax.f32 %v940_v17, 0.0 }
 0x10b   : > { %v809_v14 = vpop.f32.mrf.mxu3 }
 0x10c   : > { %1544 = vst [vmem:[%s2005_s27 + $0x58] sm:$0xff] %v1512_v11   ;;  %v682_v15 = vpop.f32.mrf.mxu0  ;;  %v810_v19 = vadd.f32 %v809_v14, %v720_v13 }
 0x10d   : > { %v771_v16 = vpop.f32.mrf.mxu1 }
 0x10e   : > { %v772_v18 = vadd.f32 %v771_v16, %v682_v15  ;;  %v956_v25 = vadd.f32 %v1999_v51, %v810_v19 }
 0x110   : > { %v941_v20 = vadd.f32 %v1999_v51, %v772_v18  ;;  %v988_v31 = vmax.f32 %v956_v25, 0.0 }
 0x112   : > { %v973_v22 = vmax.f32 %v941_v20, 0.0  ;;  %v722_v23 = vpop.f32.mrf.mxu2 }
 0x113   : > { %v811_v24 = vpop.f32.mrf.mxu3 }
 0x114   : > { %v1477_v26 = vpack.c.bf16 %v973_v22, %v972_v21  ;;  %v812_v27 = vadd.f32 %v811_v24, %v722_v23  ;;  %v685_v28 = vpop.f32.mrf.mxu0 }
 0x115   : > { %v774_v29 = vpop.f32.mrf.mxu1 }
 0x116   : > { %1537 = vst [vmem:[%s2005_s27 + $0x20] sm:$0xff] %v1477_v26   ;;  %v957_v30 = vadd.f32 %v1999_v51, %v812_v27  ;;  %v775_v34 = vadd.f32 %v774_v29, %v685_v28 }
 0x118   : > { %v989_v32 = vmax.f32 %v957_v30, 0.0  ;;  %v942_v39 = vadd.f32 %v1999_v51, %v775_v34 }
 0x11a   : > { %v1517_v33 = vpack.c.bf16 %v989_v32, %v988_v31  ;;  %v725_v35 = vpop.f32.mrf.mxu2  ;;  %v974_v43 = vmax.f32 %v942_v39, 0.0 }
 0x11b   : > { %v814_v36 = vpop.f32.mrf.mxu3 }
 0x11c   : > { %1545 = vst [vmem:[%s2005_s27 + $0x60] sm:$0xff] %v1517_v33   ;;  %v687_v37 = vpop.f32.mrf.mxu0  ;;  %v815_v41 = vadd.f32 %v814_v36, %v725_v35 }
 0x11d   : > { %v776_v38 = vpop.f32.mrf.mxu1 }
 0x11e   : > { %v777_v40 = vadd.f32 %v776_v38, %v687_v37  ;;  %v958_v47 = vadd.f32 %v1999_v51, %v815_v41 }
 0x120   : > { %v943_v42 = vadd.f32 %v1999_v51, %v777_v40  ;;  %v990_v54 = vmax.f32 %v958_v47, 0.0 }
 0x122   : > { %v975_v44 = vmax.f32 %v943_v42, 0.0  ;;  %v727_v45 = vpop.f32.mrf.mxu2 }
 0x123   : > { %v816_v46 = vpop.f32.mrf.mxu3 }
 0x124   : > { %v1482_v48 = vpack.c.bf16 %v975_v44, %v974_v43  ;;  %v817_v49 = vadd.f32 %v816_v46, %v727_v45  ;;  %v690_v50 = vpop.f32.mrf.mxu0 }
 0x125   : > { %v779_v52 = vpop.f32.mrf.mxu1 }
 0x126   : > { %1538 = vst [vmem:[%s2005_s27 + $0x28] sm:$0xff] %v1482_v48   ;;  %v959_v53 = vadd.f32 %v1999_v51, %v817_v49  ;;  %v780_v57 = vadd.f32 %v779_v52, %v690_v50 }
 0x128   : > { %v991_v55 = vmax.f32 %v959_v53, 0.0  ;;  %v944_v62 = vadd.f32 %v1999_v51, %v780_v57 }
 0x12a   : > { %v1522_v56 = vpack.c.bf16 %v991_v55, %v990_v54  ;;  %v730_v58 = vpop.f32.mrf.mxu2  ;;  %v976_v2 = vmax.f32 %v944_v62, 0.0 }
 0x12b   : > { %v819_v59 = vpop.f32.mrf.mxu3 }
 0x12c   : > { %1546 = vst [vmem:[%s2005_s27 + $0x68] sm:$0xff] %v1522_v56   ;;  %v692_v60 = vpop.f32.mrf.mxu0  ;;  %v820_v0 = vadd.f32 %v819_v59, %v730_v58 }
 0x12d   : > { %v781_v61 = vpop.f32.mrf.mxu1 }
 0x12e   : > { %v782_v63 = vadd.f32 %v781_v61, %v692_v60  ;;  %v960_v6 = vadd.f32 %v1999_v51, %v820_v0 }
 0x130   : > { %v945_v1 = vadd.f32 %v1999_v51, %v782_v63  ;;  %v992_v12 = vmax.f32 %v960_v6, 0.0 }
 0x132   : > { %v977_v3 = vmax.f32 %v945_v1, 0.0  ;;  %v732_v4 = vpop.f32.mrf.mxu2 }
 0x133   : > { %v821_v5 = vpop.f32.mrf.mxu3 }
 0x134   : > { %v1487_v7 = vpack.c.bf16 %v977_v3, %v976_v2  ;;  %v822_v8 = vadd.f32 %v821_v5, %v732_v4  ;;  %v695_v9 = vpop.f32.mrf.mxu0 }
 0x135   : > { %v784_v10 = vpop.f32.mrf.mxu1 }
 0x136   : > { %1539 = vst [vmem:[%s2005_s27 + $0x30] sm:$0xff] %v1487_v7   ;;  %v961_v11 = vadd.f32 %v1999_v51, %v822_v8  ;;  %v785_v15 = vadd.f32 %v784_v10, %v695_v9 }
 0x138   : > { %v993_v13 = vmax.f32 %v961_v11, 0.0  ;;  %v946_v20 = vadd.f32 %v1999_v51, %v785_v15 }
 0x13a   : > { %v1527_v14 = vpack.c.bf16 %v993_v13, %v992_v12  ;;  %v735_v16 = vpop.f32.mrf.mxu2  ;;  %v978_v24 = vmax.f32 %v946_v20, 0.0 }
 0x13b   : > { %v824_v17 = vpop.f32.mrf.mxu3 }
 0x13c   : > { %1547 = vst [vmem:[%s2005_s27 + $0x70] sm:$0xff] %v1527_v14   ;;  %v697_v18 = vpop.f32.mrf.mxu0  ;;  %v825_v22 = vadd.f32 %v824_v17, %v735_v16 }
 0x13d   : > { %v786_v19 = vpop.f32.mrf.mxu1 }
 0x13e   : > { %v787_v21 = vadd.f32 %v786_v19, %v697_v18  ;;  %v962_v28 = vadd.f32 %v1999_v51, %v825_v22 }
 0x140   : > { %v947_v23 = vadd.f32 %v1999_v51, %v787_v21  ;;  %v994_v32 = vmax.f32 %v962_v28, 0.0 }
 0x142   : > { %v979_v25 = vmax.f32 %v947_v23, 0.0  ;;  %v737_v26 = vpop.f32.mrf.mxu2 }
 0x143   : > { %v826_v27 = vpop.f32.mrf.mxu3 }
 0x144   : > { %v1492_v29 = vpack.c.bf16 %v979_v25, %v978_v24  ;;  %v827_v30 = vadd.f32 %v826_v27, %v737_v26 }
 0x146   : > { %1540 = vst [vmem:[%s2005_s27 + $0x38] sm:$0xff] %v1492_v29   ;;  %v963_v31 = vadd.f32 %v1999_v51, %v827_v30 }
 0x148   : > { %v995_v33 = vmax.f32 %v963_v31, 0.0 }
 0x14a   : > { %v1532_v34 = vpack.c.bf16 %v995_v33, %v994_v32 }
 0x14c   : > { %1548 = vst [vmem:[%s2005_s27 + $0x78] sm:$0xff] %v1532_v34  }
 0x14d   : > { %1732 = shalt.err (!%p1729_p12)
}
 0x14e   : > { %s1798_s6 = smov 64   ;;  %s1799_s1 = smov 4  }
 0x14f   : > { %1571 = dma.vmem_to_hbm [thread:$0]  (%p1898_p3), %s1075_s26, 2048, %s1077_s15, %s1061_s28, %s1798_s6, %s1798_s6, %s1799_s1  }
 0x150 PF: > { %p1588_p13 = scmp.ge.s32.totalorder %s1791_s17, 2  ;;  %s1091_s20 = sand.u32 1, %s1771_s12  }
 0x151   : > { %s1092_s22 = scalar_lea.sflag [#allocation5], %s1091_s20 }
 0x152   : > { %p1582_p0 = pnand %p1588_p13, %p1869_p6 }
 0x154   : > { %p1583_p5 = pneg %p1582_p0 }
 0x156   : > { %1766 = dma.done.wait (%p1583_p5), %s1092_s22, 2048  }
 0x157   : > { %1768 = vsyncadd (%p1583_p5), %s1092_s22, 4294965248  ;;  %s20_s17 = sadd.s32 1, %s1791_s17   ;;  %s2103_s12 = smov %s1775_s13 }
 0x158   : > { %p17_p7 = scmp.ge.s32.totalorder %s20_s17, 10   ;;  %s2104_s13 = smov %s1779_s14 }
 0x159   : > { %s2105_s14 = smov %s1907_s18  ;;  %s2106_s15 = smov %s1787_s16 }
 0x15a   : > { %s2107_s16 = smov %s2109_s5  ;;  %19 = sbr.rel (!%p17_p7) target bundleno = 9 (0x9), region = 93 }
 0x15f   :  { %1098 = vsyncpa [#allocation4], 1 }
 0x160   :  { %1100 = vsyncpa [#allocation4 + $0x1], 1 }
 0x161   :  { %1101 = vsyncpa [#allocation7], 1 }
 0x162   :  { %1102 = vsyncpa [#allocation5], 1 }
 0x163   :  { %1104 = vsyncpa [#allocation5 + $0x1], 1 }

</bundles_post_ra>
